<compile_context>
chip_gen: v7x
topology: tpu7x:2x2x1
jax: 0.10.0
libtpu: 0.0.40
codegen_flags: <defaults>
</compile_context>

<pallas_src>
import functools

import jax
import jax.numpy as jnp
import numpy as np
from jax.experimental import pallas as pl
from jax.experimental.pallas import tpu as pltpu

LANE = 128          # TPU lane width; output slab is lane-dense.
NEG_BIG = -1e30     # finite "minus infinity": exp -> 0, no 0*inf NaN.


def _round_up(x, m):
    return ((x + m - 1) // m) * m


# ----------------------------- Pallas kernel --------------------------------
def actor_net_kernel(obs_ref, act_ref,
                     w1_ref, b1_ref, w2_ref, b2_ref, w3p_ref, b3p_ref,
                     out_ref, *, act_dim):
    obs = obs_ref[...]                                           # (TB, obs_dim)

    # MLP hot path (MXU matmuls, f32 accumulate; VPU tanh in f32).
    h1 = jnp.tanh(jnp.dot(obs, w1_ref[...],
                          preferred_element_type=jnp.float32) + b1_ref[...])
    h2 = jnp.tanh(jnp.dot(h1, w2_ref[...],
                          preferred_element_type=jnp.float32) + b2_ref[...])
    # Final layer is pre-padded to LANE output columns. Padded-lane weights are
    # 0 and padded-lane bias is NEG_BIG, so the softmax mask is already baked
    # in: no in-kernel mask/where pass needed.
    logits_p = jnp.dot(h2, w3p_ref[...],
                       preferred_element_type=jnp.float32) + b3p_ref[...]

    # Categorical(logits): stable log-sum-exp; padded lanes never win the max.
    m = jnp.max(logits_p, axis=-1, keepdims=True)                # (TB, 1)
    z = logits_p - m                                             # pad ~ -1e30
    exp_z = jnp.exp(z)                                           # pad -> 0
    sumexp = jnp.sum(exp_z, axis=-1, keepdims=True)              # (TB, 1)
    lse = jnp.log(sumexp)
    inv_sumexp = pl.reciprocal(sumexp, approx=False)             # exact; (TB,1)

    # entropy = lse - E_p[z]; padded lanes contribute exp_z*z = 0*finite = 0.
    entropy = lse - jnp.sum(exp_z * z, axis=-1, keepdims=True) * inv_sumexp

    col = jax.lax.broadcasted_iota(jnp.int32, logits_p.shape, 1)  # (TB, 128)
    act = act_ref[...]                                            # (TB, 1) int32
    onehot = (col == act).astype(jnp.float32)                     # real cols only
    logp_act = jnp.sum(z * onehot, axis=-1, keepdims=True) - lse  # (TB, 1)

    # Single lane-dense store: logits in [0, act_dim), logp at col act_dim,
    # entropy at col act_dim+1. Lanes past act_dim+1 are don't-care.
    out_ref[...] = jnp.where(col == act_dim, logp_act,
                             jnp.where(col == act_dim + 1, entropy, logits_p))


# ------------------------------ tile selection -------------------------------
def _choose_tile(B, tile_b):
    """Batch tile (multiple of 8) minimizing padding; >=2 grid steps when
    there's enough work so both v7x TensorCores get a share (no-op v5e/v6e)."""
    B8 = _round_up(max(B, 1), 8)
    tile_cap = max(_round_up(min(tile_b, B8), 8), 8)
    n_tiles = pl.cdiv(B8, tile_cap)
    if B8 > 16:
        n_tiles = max(n_tiles, 2)
    tb = _round_up(pl.cdiv(B8, n_tiles), 8)
    b_pad = tb * pl.cdiv(B8, tb)
    return tb, b_pad


# ------------------------------ JAX wrapper ----------------------------------
@functools.partial(jax.jit, static_argnames=("act_dim", "tile_b"))
def actor_net_forward(obs, act, kparams, *, act_dim, tile_b=1024):
    """Pallas analogue of Actor_Net.forward(obs, act): returns
    (logits, log_prob(act), entropy); `dist` is represented by its logits."""
    w1, b1, w2, b2, w3p, b3p = kparams
    B, obs_dim = obs.shape
    assert act_dim + 2 <= LANE

    tb, b_pad = _choose_tile(B, tile_b)
    obs_p = jnp.pad(obs, ((0, b_pad - B), (0, 0)))
    act_p = jnp.pad(act.reshape(B, 1).astype(jnp.int32), ((0, b_pad - B), (0, 0)))

    const = lambda a: pl.BlockSpec(a.shape, lambda i: (0, 0))   # resident weight

    out = pl.pallas_call(
        functools.partial(actor_net_kernel, act_dim=act_dim),
        out_shape=jax.ShapeDtypeStruct((b_pad, LANE), jnp.float32),
        grid=(b_pad // tb,),
        in_specs=[
            pl.BlockSpec((tb, obs_dim), lambda i: (i, 0)),
            pl.BlockSpec((tb, 1), lambda i: (i, 0)),
            const(w1), const(b1), const(w2), const(b2), const(w3p), const(b3p),
        ],
        out_specs=pl.BlockSpec((tb, LANE), lambda i: (i, 0)),
        compiler_params=pltpu.CompilerParams(
            dimension_semantics=("parallel",),
            vmem_limit_bytes=32 << 20),
    )(obs_p, act_p, w1, b1, w2, b2, w3p, b3p)

    logits = out[:B, :act_dim]
    logp = out[:B, act_dim]
    entropy = out[:B, act_dim + 1]
    return logits, logp, entropy


# --------------------- deterministic parameter init --------------------------
def orthogonal(key, shape, gain):
    # shape = (in, out); mimics torch orthogonal_ on a (out, in) weight, then
    # stored transposed so the kernel can do x @ W.
    out_dim, in_dim = shape[1], shape[0]
    a = jax.random.normal(key, (max(out_dim, in_dim), min(out_dim, in_dim)),
                          dtype=jnp.float32)
    q, r = jnp.linalg.qr(a)
    q = q * jnp.sign(jnp.diag(r))
    q = q[:max(out_dim, in_dim), :min(out_dim, in_dim)]
    w_out_in = q if out_dim >= in_dim else q.T               # (out, in)
    return (gain * w_out_in).T.astype(jnp.float32)           # stored as (in, out)


def init_params(key, obs_dim, act_dim, hidden_sizes):
    k1, k2, k3 = jax.random.split(key, 3)
    w1 = orthogonal(k1, (obs_dim, hidden_sizes[0]), gain=float(np.sqrt(2)))
    b1 = jnp.zeros((1, hidden_sizes[0]), jnp.float32)
    w2 = orthogonal(k2, (hidden_sizes[0], hidden_sizes[1]), gain=float(np.sqrt(2)))
    b2 = jnp.zeros((1, hidden_sizes[1]), jnp.float32)
    w3 = orthogonal(k3, (hidden_sizes[1], act_dim), gain=0.01)
    b3 = jnp.zeros((1, act_dim), jnp.float32)
    return (w1, b1, w2, b2, w3, b3)


def prepare_params(params):
    """Pad the output layer to LANE columns once at init time.
    Padded weight columns are 0; padded bias lanes carry NEG_BIG, which bakes
    the softmax padding mask directly into the last matmul's output."""
    w1, b1, w2, b2, w3, b3 = params
    h2, act_dim = w3.shape
    assert act_dim + 2 <= LANE
    w3p = jnp.zeros((h2, LANE), jnp.float32).at[:, :act_dim].set(w3)
    b3p = jnp.full((1, LANE), NEG_BIG, jnp.float32).at[:, :act_dim].set(b3)
    return (w1, b1, w2, b2, w3p, b3p)


# ---------------------------------- main -------------------------------------
if __name__ == "__main__":
    obs_dim, act_dim = 16, 4
    hidden_sizes = (32, 32)
    B = 8

    key = jax.random.PRNGKey(0)
    k_obs, k_act, k_par = jax.random.split(key, 3)

    obs = jax.random.normal(k_obs, (B, obs_dim), dtype=jnp.float32)
    act = jax.random.randint(k_act, (B,), 0, act_dim, dtype=jnp.int32)
    params = init_params(k_par, obs_dim, act_dim, hidden_sizes)
    kparams = prepare_params(params)

    logits, logp, entropy = actor_net_forward(obs, act, kparams,
                                              act_dim=act_dim, tile_b=1024)
    jax.block_until_ready((logits, logp, entropy))

    # pure-JAX reference check
    w1, b1, w2, b2, w3, b3 = params
    h1 = jnp.tanh(obs @ w1 + b1)
    h2 = jnp.tanh(h1 @ w2 + b2)
    logits_ref = h2 @ w3 + b3
    logp_all = jax.nn.log_softmax(logits_ref, axis=-1)
    logp_ref = jnp.take_along_axis(logp_all, act[:, None], axis=-1)[:, 0]
    ent_ref = -jnp.sum(jnp.exp(logp_all) * logp_all, axis=-1)

    np.testing.assert_allclose(np.asarray(logits), np.asarray(logits_ref),
                               rtol=1e-5, atol=1e-5)
    np.testing.assert_allclose(np.asarray(logp), np.asarray(logp_ref),
                               rtol=1e-5, atol=1e-5)
    np.testing.assert_allclose(np.asarray(entropy), np.asarray(ent_ref),
                               rtol=1e-5, atol=1e-5)

    print("KERNEL_OK")
</pallas_src>

<mosaic_0001>
module attributes {stable_mosaic.version = 11 : i64} {
  func.func @actor_net_kernel(%arg0: i32, %arg1: memref<8x16xf32, #tpu.memory_space<vmem>>, %arg2: memref<8x1xi32, #tpu.memory_space<vmem>>, %arg3: memref<16x32xf32, #tpu.memory_space<vmem>>, %arg4: memref<1x32xf32, #tpu.memory_space<vmem>>, %arg5: memref<32x32xf32, #tpu.memory_space<vmem>>, %arg6: memref<1x32xf32, #tpu.memory_space<vmem>>, %arg7: memref<32x128xf32, #tpu.memory_space<vmem>>, %arg8: memref<1x128xf32, #tpu.memory_space<vmem>>, %arg9: memref<8x128xf32, #tpu.memory_space<vmem>>) attributes {dimension_semantics = [#tpu.dimension_semantics<parallel>], iteration_bounds = array<i64: 1>, scalar_prefetch = 0 : i64, scratch_operands = 0 : i64, tpu.core_type = #tpu.core_type<tc>, window_params = [{transform_indices = @transform_0, window_bounds = array<i64: 8, 16>}, {transform_indices = @transform_1, window_bounds = array<i64: 8, 1>}, {pipeline_mode = #tpu.pipeline_mode<synchronous>, transform_indices = @transform_2, window_bounds = array<i64: 16, 32>}, {pipeline_mode = #tpu.pipeline_mode<synchronous>, transform_indices = @transform_3, window_bounds = array<i64: 1, 32>}, {pipeline_mode = #tpu.pipeline_mode<synchronous>, transform_indices = @transform_4, window_bounds = array<i64: 32, 32>}, {pipeline_mode = #tpu.pipeline_mode<synchronous>, transform_indices = @transform_5, window_bounds = array<i64: 1, 32>}, {pipeline_mode = #tpu.pipeline_mode<synchronous>, transform_indices = @transform_6, window_bounds = array<i64: 32, 128>}, {pipeline_mode = #tpu.pipeline_mode<synchronous>, transform_indices = @transform_7, window_bounds = array<i64: 1, 128>}, {transform_indices = @transform_8, window_bounds = array<i64: 8, 128>}]} {
    %c0 = arith.constant 0 : index
    %c0_0 = arith.constant 0 : index
    %0 = vector.load %arg1[%c0, %c0_0] : memref<8x16xf32, #tpu.memory_space<vmem>>, vector<8x16xf32>
    %c0_1 = arith.constant 0 : index
    %c0_2 = arith.constant 0 : index
    %1 = vector.load %arg3[%c0_1, %c0_2] : memref<16x32xf32, #tpu.memory_space<vmem>>, vector<16x32xf32>
    %cst = arith.constant dense<0.000000e+00> : vector<8x32xf32>
    %2 = tpu.matmul %0, %1, %cst {dimension_numbers = #tpu.dot_dimension_numbers<[1], [0], [0], [1], [0, 0, 1, 1], [], []>} : vector<8x16xf32>, vector<16x32xf32>, vector<8x32xf32> -> vector<8x32xf32>
    %c0_3 = arith.constant 0 : index
    %c0_4 = arith.constant 0 : index
    %3 = vector.load %arg4[%c0_3, %c0_4] : memref<1x32xf32, #tpu.memory_space<vmem>>, vector<1x32xf32>
    %4 = vector.broadcast %3 : vector<1x32xf32> to vector<8x32xf32>
    %5 = arith.addf %2, %4 : vector<8x32xf32>
    %6 = math.tanh %5 : vector<8x32xf32>
    %c0_5 = arith.constant 0 : index
    %c0_6 = arith.constant 0 : index
    %7 = vector.load %arg5[%c0_5, %c0_6] : memref<32x32xf32, #tpu.memory_space<vmem>>, vector<32x32xf32>
    %cst_7 = arith.constant dense<0.000000e+00> : vector<8x32xf32>
    %8 = tpu.matmul %6, %7, %cst_7 {dimension_numbers = #tpu.dot_dimension_numbers<[1], [0], [0], [1], [0, 0, 1, 1], [], []>} : vector<8x32xf32>, vector<32x32xf32>, vector<8x32xf32> -> vector<8x32xf32>
    %c0_8 = arith.constant 0 : index
    %c0_9 = arith.constant 0 : index
    %9 = vector.load %arg6[%c0_8, %c0_9] : memref<1x32xf32, #tpu.memory_space<vmem>>, vector<1x32xf32>
    %10 = vector.broadcast %9 : vector<1x32xf32> to vector<8x32xf32>
    %11 = arith.addf %8, %10 : vector<8x32xf32>
    %12 = math.tanh %11 : vector<8x32xf32>
    %c0_10 = arith.constant 0 : index
    %c0_11 = arith.constant 0 : index
    %13 = vector.load %arg7[%c0_10, %c0_11] : memref<32x128xf32, #tpu.memory_space<vmem>>, vector<32x128xf32>
    %cst_12 = arith.constant dense<0.000000e+00> : vector<8x128xf32>
    %14 = tpu.matmul %12, %13, %cst_12 {dimension_numbers = #tpu.dot_dimension_numbers<[1], [0], [0], [1], [0, 0, 1, 1], [], []>} : vector<8x32xf32>, vector<32x128xf32>, vector<8x128xf32> -> vector<8x128xf32>
    %c0_13 = arith.constant 0 : index
    %c0_14 = arith.constant 0 : index
    %15 = vector.load %arg8[%c0_13, %c0_14] : memref<1x128xf32, #tpu.memory_space<vmem>>, vector<1x128xf32>
    %16 = vector.broadcast %15 : vector<1x128xf32> to vector<8x128xf32>
    %17 = arith.addf %14, %16 : vector<8x128xf32>
    %cst_15 = arith.constant dense<0xFF800000> : vector<8xf32>
    %18 = vector.multi_reduction <maximumf>, %17, %cst_15 [1] : vector<8x128xf32> to vector<8xf32>
    %19 = vector.shape_cast %18 : vector<8xf32> to vector<8x1xf32>
    %20 = vector.broadcast %19 : vector<8x1xf32> to vector<8x128xf32>
    %21 = arith.subf %17, %20 : vector<8x128xf32>
    %22 = math.exp %21 : vector<8x128xf32>
    %cst_16 = arith.constant dense<0.000000e+00> : vector<8xf32>
    %23 = vector.multi_reduction <add>, %22, %cst_16 [1] : vector<8x128xf32> to vector<8xf32>
    %24 = vector.shape_cast %23 : vector<8xf32> to vector<8x1xf32>
    %25 = math.log %24 : vector<8x1xf32>
    %26 = tpu.reciprocal %24 : vector<8x1xf32> -> vector<8x1xf32>
    %27 = arith.mulf %22, %21 : vector<8x128xf32>
    %cst_17 = arith.constant dense<0.000000e+00> : vector<8xf32>
    %28 = vector.multi_reduction <add>, %27, %cst_17 [1] : vector<8x128xf32> to vector<8xf32>
    %29 = vector.shape_cast %28 : vector<8xf32> to vector<8x1xf32>
    %30 = arith.mulf %29, %26 : vector<8x1xf32>
    %31 = arith.subf %25, %30 : vector<8x1xf32>
    %32 = tpu.iota {dimensions = array<i32: 1>} : vector<8x128xi32>
    %c0_18 = arith.constant 0 : index
    %c0_19 = arith.constant 0 : index
    %33 = vector.load %arg2[%c0_18, %c0_19] : memref<8x1xi32, #tpu.memory_space<vmem>>, vector<8x1xi32>
    %34 = vector.broadcast %33 : vector<8x1xi32> to vector<8x128xi32>
    %35 = arith.cmpi eq, %32, %34 : vector<8x128xi32>
    %36 = arith.extui %35 : vector<8x128xi1> to vector<8x128xi32>
    %37 = arith.sitofp %36 : vector<8x128xi32> to vector<8x128xf32>
    %38 = arith.mulf %21, %37 : vector<8x128xf32>
    %cst_20 = arith.constant dense<0.000000e+00> : vector<8xf32>
    %39 = vector.multi_reduction <add>, %38, %cst_20 [1] : vector<8x128xf32> to vector<8xf32>
    %40 = vector.shape_cast %39 : vector<8xf32> to vector<8x1xf32>
    %41 = arith.subf %40, %25 : vector<8x1xf32>
    %c4_i32 = arith.constant 4 : i32
    %42 = vector.broadcast %c4_i32 : i32 to vector<8x128xi32>
    %43 = arith.cmpi eq, %32, %42 : vector<8x128xi32>
    %c5_i32 = arith.constant 5 : i32
    %44 = vector.broadcast %c5_i32 : i32 to vector<8x128xi32>
    %45 = arith.cmpi eq, %32, %44 : vector<8x128xi32>
    %46 = vector.shape_cast %31 : vector<8x1xf32> to vector<8x1xf32>
    %47 = vector.broadcast %46 : vector<8x1xf32> to vector<8x128xf32>
    %48 = arith.select %45, %47, %17 : vector<8x128xi1>, vector<8x128xf32>
    %49 = vector.shape_cast %41 : vector<8x1xf32> to vector<8x1xf32>
    %50 = vector.broadcast %49 : vector<8x1xf32> to vector<8x128xf32>
    %51 = arith.select %43, %50, %48 : vector<8x128xi1>, vector<8x128xf32>
    %c0_21 = arith.constant 0 : index
    %c0_22 = arith.constant 0 : index
    %52 = vector.load %arg9[%c0_21, %c0_22] : memref<8x128xf32, #tpu.memory_space<vmem>>, vector<8x128xf32>
    tpu.vector_store %arg9[%c0_21, %c0_22], %51 {strides = array<i32>} : memref<8x128xf32, #tpu.memory_space<vmem>>, vector<8x128xf32>,
    return
  }
  func.func @transform_0(%arg0: i32) -> (i32, i32) {
    %c0_i32 = arith.constant 0 : i32
    %c0_i32_0 = arith.constant 0 : i32
    return %arg0, %c0_i32 : i32, i32
  }
  func.func @transform_1(%arg0: i32) -> (i32, i32) {
    %c0_i32 = arith.constant 0 : i32
    %c0_i32_0 = arith.constant 0 : i32
    return %arg0, %c0_i32 : i32, i32
  }
  func.func @transform_2(%arg0: i32) -> (i32, i32) {
    %c0_i32 = arith.constant 0 : i32
    %c0_i32_0 = arith.constant 0 : i32
    %c0_i32_1 = arith.constant 0 : i32
    return %c0_i32, %c0_i32_0 : i32, i32
  }
  func.func @transform_3(%arg0: i32) -> (i32, i32) {
    %c0_i32 = arith.constant 0 : i32
    %c0_i32_0 = arith.constant 0 : i32
    %c0_i32_1 = arith.constant 0 : i32
    return %c0_i32, %c0_i32_0 : i32, i32
  }
  func.func @transform_4(%arg0: i32) -> (i32, i32) {
    %c0_i32 = arith.constant 0 : i32
    %c0_i32_0 = arith.constant 0 : i32
    %c0_i32_1 = arith.constant 0 : i32
    return %c0_i32, %c0_i32_0 : i32, i32
  }
  func.func @transform_5(%arg0: i32) -> (i32, i32) {
    %c0_i32 = arith.constant 0 : i32
    %c0_i32_0 = arith.constant 0 : i32
    %c0_i32_1 = arith.constant 0 : i32
    return %c0_i32, %c0_i32_0 : i32, i32
  }
  func.func @transform_6(%arg0: i32) -> (i32, i32) {
    %c0_i32 = arith.constant 0 : i32
    %c0_i32_0 = arith.constant 0 : i32
    %c0_i32_1 = arith.constant 0 : i32
    return %c0_i32, %c0_i32_0 : i32, i32
  }
  func.func @transform_7(%arg0: i32) -> (i32, i32) {
    %c0_i32 = arith.constant 0 : i32
    %c0_i32_0 = arith.constant 0 : i32
    %c0_i32_1 = arith.constant 0 : i32
    return %c0_i32, %c0_i32_0 : i32, i32
  }
  func.func @transform_8(%arg0: i32) -> (i32, i32) {
    %c0_i32 = arith.constant 0 : i32
    %c0_i32_0 = arith.constant 0 : i32
    return %arg0, %c0_i32 : i32, i32
  }
}

</mosaic_0001>

<bundles_post_ra>
// kernel: actor_net_forward.1
= control target key start
LH: loop header
LB: loop body
LE: loop exit
PB: predicated region body
PF: predicated region fallthrough
CT: control target
= control target key end

     0   :  { %13 = vsyncpa [#allocation3], 0  ;;  %s645_s0 = inlined_call_operand.hbm [shape: f32[8,16], index: 0, kind: input, shape index: {}]   ;;  %s646_s1 = inlined_call_operand.vmem [shape: s32[8,1], index: 1, kind: input, shape index: {}]   ;;  %s647_s2 = inlined_call_operand.hbm [shape: f32[16,32], index: 2, kind: input, shape index: {}]   ;;  %s648_s3 = inlined_call_operand.vmem [shape: f32[1,32], index: 3, kind: input, shape index: {}]   ;;  %s649_s4 = inlined_call_operand.hbm [shape: f32[32,32], index: 4, kind: input, shape index: {}]   ;;  %s650_s5 = inlined_call_operand.vmem [shape: f32[1,32], index: 5, kind: input, shape index: {}]   ;;  %s651_s6 = inlined_call_operand.vmem [shape: f32[32,128], index: 6, kind: input, shape index: {}]   ;;  %s652_s7 = inlined_call_operand.vmem [shape: f32[1,128], index: 7, kind: input, shape index: {}]   ;;  %s653_s8 = inlined_call_operand.vmem [shape: f32[8,128], index: 8, kind: output, shape index: {}]  }
   0x1   :  { %14 = vsyncpa [#allocation5], 0  ;;  %s516_s27 = smov [#allocation4]   ;;  %s446_s9 = scalar_lea.hbm %s647_s2, 256 }
   0x2   :  { %s32_s28 = sshll.u32 %s516_s27, 4  ;;  %p447_p0 = scmp.ne.s32.totalorder %s647_s2, %s446_s9  ;;  %s33_s28 = int_to_ptr.vmem [resolvable:$true] %s32_s28 }
   0x3   :  { %p450_p1 = scmp.lt.u32.totalorder %s446_s9, %s647_s2 }
   0x5   :  { %p452_p2 = pnand %p450_p1, %p447_p0 }
   0x7   :  { %455 = shalt.err (!%p452_p2)
}
   0x8   :  { %s456_s14 = scalar_lea.vmem %s33_s28, 256  ;;  %p461_p4 = scmp.lt.s32.totalorder %s33_s28, %s33_s28 }
   0x9   :  { %p457_p3 = scmp.ne.s32.totalorder %s33_s28, %s456_s14  ;;  %p462_p5 = scmp.lt.s32.totalorder %s456_s14, %s456_s14 }
   0xb   :  { %p463_p6 = por %p462_p5, %p461_p4 }
   0xd   :  { %p464_p7 = pnand %p463_p6, %p457_p3 }
   0xf   :  { %467 = shalt.err (!%p464_p7)
}
  0x10   :  { %s517_s15 = smov 128   ;;  %s518_s16 = smov 8  }
  0x11   :  { %38 = dma.hbm_to_vmem [thread:$0]  %s647_s2, 256, %s33_s28, [#allocation5], %s517_s15, %s517_s15, %s518_s16  }
  0x12   :  { %s519_s19 = smov [#allocation2]   ;;  %s520_s21 = smov [#allocation6]  }
  0x13   :  { %s21_s20 = sshll.u32 %s519_s19, 4  ;;  %s46_s22 = sshll.u32 %s520_s21, 4  ;;  %s22_s20 = int_to_ptr.vmem [resolvable:$true] %s21_s20  ;;  %s47_s22 = int_to_ptr.vmem [resolvable:$true] %s46_s22 }
  0x14   :  { %s468_s25 = scalar_lea.hbm %s645_s0, 128 }
  0x15   :  { %p469_p8 = scmp.ne.s32.totalorder %s645_s0, %s468_s25  ;;  %p472_p9 = scmp.lt.u32.totalorder %s468_s25, %s645_s0 }
  0x17   :  { %p474_p10 = pnand %p472_p9, %p469_p8 }
  0x19   :  { %477 = shalt.err (!%p474_p10)
}
  0x1a   :  { %s478_s2 = scalar_lea.vmem %s22_s20, 128  ;;  %p483_p12 = scmp.lt.s32.totalorder %s22_s20, %s22_s20 }
  0x1b   :  { %p479_p11 = scmp.ne.s32.totalorder %s22_s20, %s478_s2  ;;  %p484_p13 = scmp.lt.s32.totalorder %s478_s2, %s478_s2 }
  0x1d   :  { %p485_p0 = por %p484_p13, %p483_p12 }
  0x1f   :  { %p486_p1 = pnand %p485_p0, %p479_p11 }
  0x21   :  { %489 = shalt.err (!%p486_p1)
}
  0x22   :  { %24 = dma.hbm_to_vmem [thread:$0]  %s645_s0, 128, %s22_s20, [#allocation3]  }
  0x23   :  { %s490_s12 = scalar_lea.hbm %s649_s4, 512 }
  0x24   :  { %p491_p2 = scmp.ne.s32.totalorder %s649_s4, %s490_s12  ;;  %p494_p3 = scmp.lt.u32.totalorder %s490_s12, %s649_s4 }
  0x26   :  { %p496_p4 = pnand %p494_p3, %p491_p2 }
  0x28   :  { %499 = shalt.err (!%p496_p4)
}
  0x29   :  { %s500_s19 = scalar_lea.vmem %s47_s22, 512  ;;  %p505_p6 = scmp.lt.s32.totalorder %s47_s22, %s47_s22 }
  0x2a   :  { %p501_p5 = scmp.ne.s32.totalorder %s47_s22, %s500_s19  ;;  %p506_p7 = scmp.lt.s32.totalorder %s500_s19, %s500_s19 }
  0x2c   :  { %p507_p8 = por %p506_p7, %p505_p6 }
  0x2e   :  { %p508_p9 = pnand %p507_p8, %p501_p5 }
  0x30   :  { %511 = shalt.err (!%p508_p9)
}
  0x31   :  { %52 = dma.hbm_to_vmem [thread:$0]  %s649_s4, 512, %s47_s22, [#allocation5], %s517_s15, %s517_s15, %s518_s16  }
  0x32   :  { %512 = dma.done.wait [#allocation3], 128  }
  0x33   :  { %513 = vsyncadd [#allocation3], 4294967168 }
  0x34   :  { %514 = dma.done.wait [#allocation5], 768  }
  0x35   :  { %515 = vsyncadd [#allocation5], 4294966528  ;;  %v521_v0 = vmov 0.0|0.0   ;;  %vm522_vm0 = vmmov 0   ;;  %v523_v1 = vmov 0.0   ;;  %v69_v2 = vld [vmem:[#allocation4] sm:$0xff]  ;;  %v338_v37 = vlaneseq }
  0x36   :  { %411 = vmatprep.subr.bf16.mxu0 %v521_v0  ;;  %386 = vmatprep.mubr.msk.f32.mxu0 %vm522_vm0, %v523_v1  ;;  %v70_v3 = vld [vmem:[#allocation4 + $0x8] sm:$0xff]  ;;  %v68_v5 = vld [vmem:[#allocation2] sm:$0xff]  ;;  %vm78_vm1 = vcmask 130048   ;;  %v153_v6 = vld [vmem:[#allocation6] sm:$0xff]  ;;  %vm164_vm2 = vcmask 261120   ;;  %v524_v28 = vmov 0  }
  0x37   :  { %414 = vmatprep.subr.bf16.mxu1 %v521_v0  ;;  %397 = vmatprep.mubr.msk.f32.mxu1 %vm522_vm0, %v523_v1  ;;  %v412_v4 = vpack.c.bf16 %v70_v3, %v69_v2  ;;  %v154_v7 = vld [vmem:[#allocation6 + $0x8] sm:$0xff]  ;;  %v155_v8 = vld [vmem:[#allocation6 + $0x10] sm:$0xff]  ;;  %v156_v10 = vld [vmem:[#allocation6 + $0x18] sm:$0xff]  ;;  %v339_v38 = vand.u32 127, %v338_v37 }
  0x38   :  { %v415_v9 = vpack.c.bf16 %v154_v7, %v153_v6  ;;  %v418_v11 = vpack.c.bf16 %v156_v10, %v155_v8  ;;  %v362_v12 = vld [vmem:[%s648_s3] ss:$0 sm:$0xff]  ;;  %v240_v18 = vld [vmem:[%s651_s6 + $0x8] sm:$0xff]  ;;  %v241_v19 = vld [vmem:[%s651_s6 + $0x10] sm:$0xff]  ;;  %435 = vset.pattern.permute.xlu0 %v524_v28 }
  0x39   :  { %413 = vmatpush3.bf16.msra.mxu0 %v412_v4  ;;  %v239_v17 = vld [vmem:[%s651_s6] sm:$0xff]  ;;  %v242_v21 = vld [vmem:[%s651_s6 + $0x18] sm:$0xff]  ;;  %vm352_vm4 = vcmp.eq.s32.totalorder %v339_v38, 5  ;;  %vm351_vm5 = vcmp.eq.s32.totalorder %v339_v38, 4 }
  0x3a   :  { %420 = vmatprep.subr.bf16.mxu0 %v521_v0  ;;  %416 = vmatpush3.bf16.msra.mxu1 %v415_v9  ;;  %v421_v20 = vpack.c.bf16 %v240_v18, %v239_v17  ;;  %v424_v22 = vpack.c.bf16 %v242_v21, %v241_v19  ;;  %v364_v23 = vld [vmem:[%s650_s5] ss:$0 sm:$0xff] }
  0x3b   :  { %417 = vmatprep.subr.bf16.mxu1 %v521_v0  ;;  %v366_v29 = vld [vmem:[%s652_s7] ss:$0 sm:$0xff] }
  0x3c   :  { %387 = vmatmul.mubr.msk.f32.vlgmr.msra.gmra.mrb[0].mxu0 %vm78_vm1, %v68_v5  ;;  %v340_v33 = vld [vmem:[%s646_s1] sm:$0xff] }
  0x3d   :  { %408 = vmatprep.mubr.msk.f32.mxu0 %vm522_vm0, %v523_v1  ;;  %422 = vmatpush3.bf16.msra.mxu0 %v421_v20 }
  0x3e   :  { %419 = vmatpush3.bf16.msra.mxu1 %v418_v11  ;;  %423 = vmatprep.subr.bf16.mxu0 %v521_v0 }
  0x41   :  { %425 = vmatpush3.bf16.msra.mxu0 %v424_v22 }
 0x10f   :  { %v148_v13 = vpop.f32.mrb[0].mxu0 }
 0x110   :  { %v149_v14 = vadd.f32 %v362_v12, %v148_v13  ;;  %v388_v15 = vpop.f32.mrb[1].mxu0 }
 0x112   :  { %436 = vtanh.f32 %v149_v14 }
 0x11c   :  { %v437_v16 = vpop.eup %436 }
 0x11d   :  { %398 = vmatmul.mubr.msk.f32.vlgmr.msra.gmra.mrb[0].mxu1 %vm164_vm2, %v437_v16 }
 0x1f0   :  { %v234_v24 = vpop.f32.mrb[0].mxu1 }
 0x1f1   :  { %v235_v25 = vadd.f32 %v364_v23, %v234_v24  ;;  %v399_v26 = vpop.f32.mrb[1].mxu1 }
 0x1f3   :  { %438 = vtanh.f32 %v235_v25 }
 0x1fd   :  { %v439_v27 = vpop.eup %438 }
 0x1fe   :  { %409 = vmatmul.mubr.msk.f32.vlgmr.msra.gmra.mrb[2].mxu0 %vm164_vm2, %v439_v27 }
 0x2d1   :  { %v319_v30 = vpop.f32.mrb[2].mxu0 }
 0x2d2   :  { %v320_v31 = vadd.f32 %v366_v29, %v319_v30  ;;  %v410_v32 = vpop.f32.mrb[3].mxu0 }
 0x2d4   :  { %323 = vmax.xlane.f32.xlu0 %v320_v31 }
 0x2ea   :  { %342 = vperm.xlu0 %435, %v340_v33  }
 0x361   :  { %v324_v34 = vpop.xlane.xlu0 %323 }
 0x362   :  { %v325_v35 = vsub.f32 %v320_v31, %v324_v34 }
 0x364   :  { %v326_v36 = vmul.f32 1.442695, %v325_v35 }
 0x366   :  { %440 = vpow2.f32 %v326_v36 }
 0x369   :  { %v343_v39 = vpop.permute.xlu0 %342 }
 0x36a   :  { %vm344_vm3 = vcmp.eq.s32.totalorder %v339_v38, %v343_v39 }
 0x36b   :  { %v368_v42 = vsel %vm344_vm3, 1.0, %v523_v1 }
 0x36c   :  { %v347_v43 = vmul.f32 %v368_v42, %v325_v35 }
 0x370   :  { %v441_v40 = vpop.eup %440 }
 0x371   :  { %328 = vadd.xlane.f32.xlu1 %v441_v40  ;;  %v333_v41 = vmul.f32 %v441_v40, %v325_v35 }
 0x375   :  { %334 = vadd.xlane.f32.xlu1 %v333_v41 }
 0x379   :  { %348 = vadd.xlane.f32.xlu1 %v347_v43 }
 0x3fe   :  { %v329_v44 = vpop.xlane.xlu1 %328 }
 0x3ff   :  { %442 = vlog2.f32 %v329_v44 }
 0x400   :  { %444 = vrcp.f32 %v329_v44 }
 0x402   :  { %v335_v45 = vpop.xlane.xlu1 %334 }
 0x406   :  { %v349_v50 = vpop.xlane.xlu1 %348 }
 0x409   :  { %v443_v46 = vpop.eup %442 }
 0x40a   :  { %v445_v47 = vpop.eup %444  ;;  %v331_v48 = vmul.f32 0.6931472, %v443_v46 }
 0x40b   :  { %v336_v49 = vmul.f32 %v445_v47, %v335_v45 }
 0x40c   :  { %v350_v51 = vsub.f32 %v349_v50, %v331_v48 }
 0x40d   :  { %v337_v52 = vsub.f32 %v331_v48, %v336_v49 }
 0x40f   :  { %v353_v53 = vsel %vm352_vm4, %v337_v52, %v320_v31 }
 0x410   :  { %v354_v54 = vsel %vm351_vm5, %v350_v51, %v353_v53 }
 0x411   :  { %355 = vst [vmem:[%s653_s8] sm:$0xff] %v354_v54 }
 0x412   :  { %360 = vsyncpa [#allocation3], 1 }
 0x413   :  { %361 = vsyncpa [#allocation5], 1 }

</bundles_post_ra>
